<compile_context>
chip_gen: v6e
topology: v6e:2x2x1
jax: 0.10.0
libtpu: 0.0.40
codegen_flags: <defaults>
</compile_context>

<pallas_src>
import functools

import jax
import jax.numpy as jnp
from jax import lax
from jax.experimental import pallas as pl
from jax.experimental.pallas import tpu as pltpu


def _round_up(x, m):
    return ((x + m - 1) // m) * m


def _pick_batch_block(B, target=8):
    # Prefer >= 2 grid steps (keeps both v7x TensorCores busy) while still
    # amortizing the ~0.35us per-grid-step overhead over several batches.
    cap = max(1, min(target, B // 2)) if B >= 2 else 1
    for bb in range(cap, 0, -1):
        if B % bb == 0:
            return bb
    return 1


def _occupancy_kernel(x_ref, o_ref, *, num_bins, tp, nc):
    """One grid step: (bb, 3, p_pad) points -> (bb, nb, nb^2) occupancy.

    counts[b, cx, cy*nb+cz] = #points in that cell, computed as an MXU
    contraction of two one-hots over the point axis.  Exact in f32 for
    P < 2^24 points per cell (always true in practice).
    """
    bb = x_ref.shape[0]
    nb2 = num_bins * num_bins

    def chunk(c):
        start = c * tp
        if not isinstance(start, int):
            start = pl.multiple_of(start, 128)   # tp is a multiple of 128
        return x_ref[:, :, pl.ds(start, tp)].astype(jnp.float32)   # (bb, 3, tp)

    # Pass 1: per-batch abs-max over all points (chunked -> bounded vreg use).
    def max_body(c, m):
        pos_c = chunk(c)
        return jnp.maximum(m, jnp.max(jnp.abs(pos_c), axis=(1, 2), keepdims=True))

    m = lax.fori_loop(0, nc, max_body, jnp.zeros((bb, 1, 1), jnp.float32),
                      unroll=(nc <= 8))                              # (bb, 1, 1)

    # thickness = clamp(bbox_max - bbox_min, 1e-5); one exact reciprocal per
    # batch, then multiplies per point.  (No approx reciprocal here: boundary
    # points must keep their exact bin index.)
    inv_th = 1.0 / jnp.maximum(2.0 * m, 1e-5)                        # (bb, 1, 1)

    bins_x = lax.broadcasted_iota(jnp.int32, (1, num_bins, 1), 1)    # (1, nb, 1)
    bins_yz = lax.broadcasted_iota(jnp.int32, (1, 1, nb2), 2)        # (1, 1, nb^2)

    # Pass 2: chunked one-hot factorization through the MXU.
    def count_body(c, counts):
        pos_c = chunk(c)                                             # (bb, 3, tp)
        cell = ((pos_c + m) * inv_th * float(num_bins)).astype(jnp.int32)
        cell = jnp.clip(cell, 0, num_bins - 1)                       # (bb, 3, tp)
        cx = cell[:, 0:1, :]                                         # (bb, 1, tp)
        cyz = cell[:, 1, :] * num_bins + cell[:, 2, :]               # (bb, tp)
        mx = (cx == bins_x).astype(jnp.bfloat16)                     # (bb, nb, tp)
        myz = (cyz[:, :, None] == bins_yz).astype(jnp.bfloat16)      # (bb, tp, nb^2)
        return counts + jnp.einsum("bnp,bpq->bnq", mx, myz,
                                   preferred_element_type=jnp.float32)

    counts = lax.fori_loop(0, nc, count_body,
                           jnp.zeros((bb, num_bins, nb2), jnp.float32),
                           unroll=(nc <= 8))                         # (bb, nb, nb^2)

    o_ref[...] = (counts > 0.0).astype(jnp.float32)


def occupancy_grid_extractor(x, num_bins):
    """JAX/Pallas equivalent of OccupancyGridExtractor(num_bins).forward(x).

    x: (B, P, C) with C >= 3.  Returns (B, num_bins**3) float32 occupancy grid.
    """
    B, P, C = x.shape
    nb2 = num_bins * num_bins
    G = num_bins * nb2

    # Layout plumbing (wrapper side): coords -> sublanes, points -> lanes.
    xt = jnp.transpose(x[:, :, 0:3].astype(jnp.float32), (0, 2, 1))  # (B, 3, P)

    # Point-chunk size (multiple of 128).  Pad P by replicating point 0, which
    # is occupancy-neutral (a duplicate lands in an already-occupied cell).
    tp = _round_up(P, 128) if P <= 512 else 512
    p_pad = _round_up(P, tp)
    if p_pad > P:
        pad = jnp.broadcast_to(xt[:, :, :1], (B, 3, p_pad - P))
        xt = jnp.concatenate([xt, pad], axis=2)
    nc = p_pad // tp

    bb = _pick_batch_block(B)
    kernel = functools.partial(_occupancy_kernel, num_bins=num_bins, tp=tp, nc=nc)

    # VMEM budget: double-buffered input block + output block (+ slack).
    # Only raise the scoped limit above the 32 MiB default when needed; cap at
    # 64 MiB (v7x physical VMEM).
    vmem_est = 2 * (bb * 3 * p_pad * 4) + 2 * (bb * num_bins * nb2 * 4) + (4 << 20)
    cp_kwargs = dict(dimension_semantics=("parallel",))
    if vmem_est > (32 << 20):
        cp_kwargs["vmem_limit_bytes"] = min(vmem_est, 64 << 20)

    out3 = pl.pallas_call(
        kernel,
        out_shape=jax.ShapeDtypeStruct((B, num_bins, nb2), jnp.float32),
        grid=(B // bb,),
        in_specs=[pl.BlockSpec((bb, 3, p_pad), lambda i: (i, 0, 0))],
        out_specs=pl.BlockSpec((bb, num_bins, nb2), lambda i: (i, 0, 0)),
        compiler_params=pltpu.CompilerParams(**cp_kwargs),
    )(xt)

    # (B, nb, nb^2) row-major == flat index (cx*nb + cy)*nb + cz.
    return out3.reshape(B, G)


def _reference(x, num_bins):
    # Pure-JAX mirror of the torch module (same float path as the kernel:
    # multiply by the exact per-batch reciprocal instead of dividing per point).
    pos = x[:, :, 0:3].astype(jnp.float32)
    m = jnp.max(jnp.abs(pos), axis=(1, 2), keepdims=True)            # (B,1,1)
    inv_th = 1.0 / jnp.maximum(2.0 * m, 1e-5)
    cell = ((pos + m) * inv_th * float(num_bins)).astype(jnp.int32)
    cell = jnp.clip(cell, 0, num_bins - 1)
    flat = (cell[..., 0] * num_bins + cell[..., 1]) * num_bins + cell[..., 2]
    B = x.shape[0]
    G = num_bins ** 3
    freq = jnp.zeros((B, G), jnp.float32).at[jnp.arange(B)[:, None], flat].add(1.0)
    return (freq > 0.0).astype(jnp.float32)


if __name__ == "__main__":
    key = jax.random.PRNGKey(0)
    k1, k2 = jax.random.split(key)

    # Case 1: small shapes, single P-chunk, one batch per grid step.
    num_bins = 4
    B, P, C = 2, 128, 6
    x = jax.random.normal(k1, (B, P, C), dtype=jnp.float32)
    out = jax.block_until_ready(occupancy_grid_extractor(x, num_bins))
    ref = _reference(x, num_bins)
    assert out.shape == (B, num_bins ** 3) and out.dtype == jnp.float32
    assert bool(jnp.all(out == ref)), "case 1: Pallas output mismatch vs reference"

    # Case 2: exercises P-chunking (nc=2), point padding, batch blocking (bb=2).
    num_bins2 = 8
    B2, P2, C2 = 4, 640, 3
    x2 = jax.random.normal(k2, (B2, P2, C2), dtype=jnp.float32)
    out2 = jax.block_until_ready(occupancy_grid_extractor(x2, num_bins2))
    ref2 = _reference(x2, num_bins2)
    assert out2.shape == (B2, num_bins2 ** 3) and out2.dtype == jnp.float32
    assert bool(jnp.all(out2 == ref2)), "case 2: Pallas output mismatch vs reference"

    print("KERNEL_OK")
</pallas_src>

<mosaic_0001>
module attributes {stable_mosaic.version = 11 : i64} {
  func.func @_occupancy_kernel(%arg0: i32, %arg1: memref<1x3x128xf32, #tpu.memory_space<vmem>>, %arg2: memref<1x4x16xf32, #tpu.memory_space<vmem>>) attributes {dimension_semantics = [#tpu.dimension_semantics<parallel>], iteration_bounds = array<i64: 2>, scalar_prefetch = 0 : i64, scratch_operands = 0 : i64, tpu.core_type = #tpu.core_type<tc>, window_params = [{transform_indices = @transform_0, window_bounds = array<i64: 1, 3, 128>}, {transform_indices = @transform_1, window_bounds = array<i64: 1, 4, 16>}]} {
    %cst = arith.constant 0.000000e+00 : f32
    %0 = vector.broadcast %cst : f32 to vector<1x1x1xf32>
    %c0_i32 = arith.constant 0 : i32
    %c128_i32 = arith.constant 128 : i32
    %1 = arith.muli %c0_i32, %c128_i32 : i32
    %2 = tpu.assume_multiple %1, 128 : i32
    %c0 = arith.constant 0 : index
    %c0_0 = arith.constant 0 : index
    %3 = arith.index_cast %2 : i32 to index
    %4 = vector.load %arg1[%c0, %c0_0, %3] : memref<1x3x128xf32, #tpu.memory_space<vmem>>, vector<1x3x128xf32>
    %5 = math.absf %4 : vector<1x3x128xf32>
    %cst_1 = arith.constant dense<0xFF800000> : vector<1xf32>
    %6 = vector.multi_reduction <maximumf>, %5, %cst_1 [1, 2] : vector<1x3x128xf32> to vector<1xf32>
    %7 = vector.shape_cast %6 : vector<1xf32> to vector<1x1x1xf32>
    %8 = arith.maximumf %0, %7 : vector<1x1x1xf32>
    %c1_i32 = arith.constant 1 : i32
    %cst_2 = arith.constant 2.000000e+00 : f32
    %9 = vector.broadcast %cst_2 : f32 to vector<1x1x1xf32>
    %10 = arith.mulf %9, %8 : vector<1x1x1xf32>
    %cst_3 = arith.constant 9.99999974E-6 : f32
    %11 = vector.broadcast %cst_3 : f32 to vector<1x1x1xf32>
    %12 = arith.maximumf %10, %11 : vector<1x1x1xf32>
    %cst_4 = arith.constant 1.000000e+00 : f32
    %13 = vector.broadcast %cst_4 : f32 to vector<1x1x1xf32>
    %14 = arith.divf %13, %12 : vector<1x1x1xf32>
    %15 = tpu.iota {dimensions = array<i32: 1>} : vector<1x4x1xi32>
    %16 = tpu.iota {dimensions = array<i32: 2>} : vector<1x1x16xi32>
    %cst_5 = arith.constant 0.000000e+00 : f32
    %17 = vector.broadcast %cst_5 : f32 to vector<1x4x16xf32>
    %c0_i32_6 = arith.constant 0 : i32
    %c128_i32_7 = arith.constant 128 : i32
    %18 = arith.muli %c0_i32_6, %c128_i32_7 : i32
    %19 = tpu.assume_multiple %18, 128 : i32
    %c0_8 = arith.constant 0 : index
    %c0_9 = arith.constant 0 : index
    %20 = arith.index_cast %19 : i32 to index
    %21 = vector.load %arg1[%c0_8, %c0_9, %20] : memref<1x3x128xf32, #tpu.memory_space<vmem>>, vector<1x3x128xf32>
    %22 = vector.broadcast %8 : vector<1x1x1xf32> to vector<1x3x128xf32>
    %23 = arith.addf %21, %22 : vector<1x3x128xf32>
    %24 = vector.broadcast %14 : vector<1x1x1xf32> to vector<1x3x128xf32>
    %25 = arith.mulf %23, %24 : vector<1x3x128xf32>
    %cst_10 = arith.constant 4.000000e+00 : f32
    %26 = vector.broadcast %cst_10 : f32 to vector<1x3x128xf32>
    %27 = arith.mulf %25, %26 : vector<1x3x128xf32>
    %28 = arith.fptosi %27 : vector<1x3x128xf32> to vector<1x3x128xi32>
    %c0_i32_11 = arith.constant 0 : i32
    %c3_i32 = arith.constant 3 : i32
    %29 = vector.broadcast %c0_i32_11 : i32 to vector<1x3x128xi32>
    %30 = arith.maxsi %29, %28 : vector<1x3x128xi32>
    %31 = vector.broadcast %c3_i32 : i32 to vector<1x3x128xi32>
    %32 = arith.minsi %31, %30 : vector<1x3x128xi32>
    %33 = vector.extract_strided_slice %32 {offsets = [0, 0, 0], sizes = [1, 1, 128], strides = [1, 1, 1]} : vector<1x3x128xi32> to vector<1x1x128xi32>
    %34 = vector.extract_strided_slice %32 {offsets = [0, 1, 0], sizes = [1, 1, 128], strides = [1, 1, 1]} : vector<1x3x128xi32> to vector<1x1x128xi32>
    %35 = vector.shape_cast %34 : vector<1x1x128xi32> to vector<1x128xi32>
    %c4_i32 = arith.constant 4 : i32
    %36 = vector.broadcast %c4_i32 : i32 to vector<1x128xi32>
    %37 = arith.muli %35, %36 : vector<1x128xi32>
    %38 = vector.extract_strided_slice %32 {offsets = [0, 2, 0], sizes = [1, 1, 128], strides = [1, 1, 1]} : vector<1x3x128xi32> to vector<1x1x128xi32>
    %39 = vector.shape_cast %38 : vector<1x1x128xi32> to vector<1x128xi32>
    %40 = arith.addi %37, %39 : vector<1x128xi32>
    %41 = vector.broadcast %33 : vector<1x1x128xi32> to vector<1x4x128xi32>
    %42 = vector.broadcast %15 : vector<1x4x1xi32> to vector<1x4x128xi32>
    %43 = arith.cmpi eq, %41, %42 : vector<1x4x128xi32>
    %44 = arith.extui %43 : vector<1x4x128xi1> to vector<1x4x128xi32>
    %45 = arith.sitofp %44 : vector<1x4x128xi32> to vector<1x4x128xf32>
    %46 = arith.truncf %45 : vector<1x4x128xf32> to vector<1x4x128xbf16>
    %47 = vector.shape_cast %40 : vector<1x128xi32> to vector<1x128x1xi32>
    %48 = vector.broadcast %47 : vector<1x128x1xi32> to vector<1x128x16xi32>
    %49 = vector.broadcast %16 : vector<1x1x16xi32> to vector<1x128x16xi32>
    %50 = arith.cmpi eq, %48, %49 : vector<1x128x16xi32>
    %51 = arith.extui %50 : vector<1x128x16xi1> to vector<1x128x16xi32>
    %52 = arith.sitofp %51 : vector<1x128x16xi32> to vector<1x128x16xf32>
    %53 = arith.truncf %52 : vector<1x128x16xf32> to vector<1x128x16xbf16>
    "tpu.trace_start"() <{level = 10 : i32, message = "bnp,bpq->bnq"}> : () -> ()
    %cst_12 = arith.constant dense<0.000000e+00> : vector<1x4x16xf32>
    %54 = tpu.matmul %46, %53, %cst_12 {dimension_numbers = #tpu.dot_dimension_numbers<[2], [1], [1], [2], [0, 0, 0, 1, 1, 2], [0], [0]>} : vector<1x4x128xbf16>, vector<1x128x16xbf16>, vector<1x4x16xf32> -> vector<1x4x16xf32>
    "tpu.trace_stop"() : () -> ()
    %55 = arith.addf %17, %54 : vector<1x4x16xf32>
    %c1_i32_13 = arith.constant 1 : i32
    %cst_14 = arith.constant 0.000000e+00 : f32
    %56 = vector.broadcast %cst_14 : f32 to vector<1x4x16xf32>
    %57 = arith.cmpf ogt, %55, %56 : vector<1x4x16xf32>
    %58 = arith.extui %57 : vector<1x4x16xi1> to vector<1x4x16xi32>
    %59 = arith.sitofp %58 : vector<1x4x16xi32> to vector<1x4x16xf32>
    %c0_15 = arith.constant 0 : index
    %c0_16 = arith.constant 0 : index
    %c0_17 = arith.constant 0 : index
    %60 = vector.load %arg2[%c0_15, %c0_16, %c0_17] : memref<1x4x16xf32, #tpu.memory_space<vmem>>, vector<1x4x16xf32>
    tpu.vector_store %arg2[%c0_15, %c0_16, %c0_17], %59 {strides = array<i32>} : memref<1x4x16xf32, #tpu.memory_space<vmem>>, vector<1x4x16xf32>,
    return
  }
  func.func @transform_0(%arg0: i32) -> (i32, i32, i32) {
    %c0_i32 = arith.constant 0 : i32
    %c0_i32_0 = arith.constant 0 : i32
    %c0_i32_1 = arith.constant 0 : i32
    return %arg0, %c0_i32, %c0_i32_0 : i32, i32, i32
  }
  func.func @transform_1(%arg0: i32) -> (i32, i32, i32) {
    %c0_i32 = arith.constant 0 : i32
    %c0_i32_0 = arith.constant 0 : i32
    %c0_i32_1 = arith.constant 0 : i32
    return %arg0, %c0_i32, %c0_i32_0 : i32, i32, i32
  }
}

</mosaic_0001>

<bundles_post_ra>
// kernel: tpu_custom_call.1
= control target key start
LH: loop header
LB: loop body
LE: loop exit
PB: predicated region body
PF: predicated region fallthrough
CT: control target
= control target key end

     0   :  { %6 = vsyncpa [#allocation3], 0  ;;  %s710_s0 = inlined_call_operand.vmem [shape: f32[2,3,128], index: 0, kind: input, shape index: {}]   ;;  %s711_s1 = inlined_call_operand.hbm [shape: f32[2,4,16], index: 1, kind: output, shape index: {}]  }
   0x1   :  { %8 = vsyncpa [#allocation3 + $0x1], 0  ;;  %s591_s6 = smov 0   ;;  %s593_s7 = smov 0  }
   0x2   :  { %s595_s8 = smov 0   ;;  %s597_s9 = smov 0  }
   0x3 LB: > { %s612_s10 = sadd.s32 4294967295, %s575_s9   ;;  %s394_s11 = sadd.s32 4294967294, %s575_s9   ;;  %s575_s9 = sphi %s597_s9, %s717_s9   ;;  %s571_s8 = sphi %s595_s8, %s716_s8   ;;  %s567_s7 = sphi %s593_s7, %s715_s7   ;;  %s563_s6 = sphi %s591_s6, %s714_s6  }
   0x4   : > { %s616_s12 = sadd.s32 1, %s575_s9   ;;  %s47_s13 = sadd.s32 1, %s571_s8 }
   0x5   : > { %s44_s14 = ssub.s32 %s575_s9, %s616_s12  ;;  %p57_p0 = scmp.ne.s32.totalorder %s571_s8, %s567_s7 }
   0x6   : > { %p45_p1 = scmp.eq.s32.totalorder %s44_s14, 0  ;;  %p58_p2 = scmp.eq.s32.totalorder %s612_s10, 1 }
   0x7   : > { %p63_p3 = scmp.ne.s32.totalorder %s567_s7, %s563_s6  ;;  %p64_p4 = scmp.eq.s32.totalorder %s394_s11, 1 }
   0x8   : > { %s627_s15 = scalar_select %p45_p1, %s571_s8, %s47_s13  }
   0x9   : > { %p629_p5 = por %p58_p2, %p57_p0  ;;  %p633_p6 = por %p64_p4, %p63_p3 }
   0xa   : > { %p397_p7 = scmp.ge.s32.totalorder %s575_s9, 1  ;;  %p89_p8 = scmp.lt.s32.totalorder %s575_s9, 3 }
   0xc   : > { %p90_p9 = pnand %p397_p7, %p89_p8 }
   0xd   : > { %p108_p10 = scmp.lt.s32.totalorder (!%p90_p9), %s612_s10, 1  ;;  %s105_s23 = sand.u32 (!%p90_p9), 1, %s567_s7  }
   0xe   : > { %93 = sbr.rel (%p90_p9) target bundleno = 584 (0x248), region = 24  ;;  %s398_s24 = sshll.u32 (!%p90_p9), %s105_s23, 2 }
   0xf   : > { %s437_s25 = sshll.u32 (!%p90_p9), %s612_s10, 6  ;;  %s107_s26 = scalar_lea.vmem (!%p90_p9), [#allocation2], %s398_s24 }
  0x10   : > { %s335_s27 = sshll.u32 (!%p90_p9), %s107_s26, 4  ;;  %s668_s30 = scalar_lea.hbm (!%p90_p9), %s711_s1, %s437_s25  ;;  %s670_s27 = int_to_ptr.vmem [resolvable:$true] %s335_s27 }
  0x11   : > { %s322_s2 = scalar_lea.sflag (!%p90_p9), [#allocation3], %s105_s23  ;;  %s515_s3 = scalar_lea.vmem (!%p90_p9), %s670_s27, 64 }
  0x12   : > { %p516_p11 = scmp.ne.s32.totalorder (!%p90_p9), %s670_s27, %s515_s3  ;;  %s580_s4 = smov (!%p90_p9), [#allocation2]  }
  0x13   : > { %s109_s18 = scalar_select %p108_p10, %s612_s10, 1  ;;  %vm115_vm0 = vcmask 1042432   ;;  %v130_v18 = vlaneseq  ;;  %v577_v20 = vmov 0.0   ;;  %vm578_vm3 = vmmov 0  }
  0x14   : > { %449 = vmatprep.subr.bf16.mxu0 %v577_v20  ;;  %465 = vmatprep.mubr.msk.bf16.mxu0 %vm578_vm3, %v577_v20  ;;  %v579_v32 = vmov 1.0|1.0   ;;  %p517_p12 = pnand %p516_p11, %p629_p5  ;;  %s519_s5 = sshll.u32 %s580_s4, 4  ;;  %s520_s5 = int_to_ptr.vmem [resolvable:$false] %s519_s5 }
  0x15   : > { %s399_s19 = sshll.u32 %s109_s18, 2  ;;  %v645_v22 = vshrl.u32 %v130_v18, 7  ;;  %v133_v29 = vand.u32 127, %v130_v18  ;;  %s521_s10 = scalar_lea.vmem %s520_s5, 128 }
  0x16   : > { %s111_s22 = scalar_lea.vmem %s710_s0, %s399_s19  ;;  %p518_p13 = pneg %p517_p12 }
  0x17   : > { %v113_v0 = vld [vmem:[%s111_s22] sm:$0x7]  ;;  %v155_v24 = vsub.s32 1, %v645_v22  ;;  %v147_v44 = vsub.s32 0, %v645_v22  ;;  %p522_p0 = scmp.lt.s32.totalorder %s670_s27, %s520_s5  ;;  %p523_p1 = scmp.lt.s32.totalorder %s521_s10, %s515_s3 }
  0x18   : > { %v114_v1 = vand.u32 2147483647, %v113_v0 }
  0x19   : > { %p524_p2 = por %p523_p1, %p522_p0 }
  0x1a   : > { %v116_v2 = vsel %vm115_vm0, %v114_v1, -inf }
  0x1b   : > { %117 = vmax.xlane.f32.xlu0 %v116_v2  ;;  %p525_p3 = pnand %p524_p2, %p518_p13 }
  0xa4   : > { %v118_v3 = vpop.xlane.xlu0 %117 }
  0xa5   : > { %v119_v4 = vrot.slane %v118_v3, 4 }
  0xa7   : > { %v120_v5 = vmax.f32 %v118_v3, %v119_v4 }
  0xa9   : > { %v121_v6 = vrot.slane %v120_v5, 2 }
  0xab   : > { %v122_v7 = vmax.f32 %v120_v5, %v121_v6 }
  0xad   : > { %v123_v8 = vrot.slane %v122_v7, 1 }
  0xaf   : > { %v124_v9 = vmax.f32 %v122_v7, %v123_v8 }
  0xb1   : > { %v125_v10 = vmax.f32 %v124_v9, 0.0 }
  0xb3   : > { %v126_v11 = vmul.f32 2.0, %v125_v10  ;;  %v134_v13 = vadd.f32 %v125_v10, %v113_v0 }
  0xb5   : > { %v127_v12 = vmax.f32 %v126_v11, 1e-05 }
  0xb7   : > { %513 = vrcp.f32 %v127_v12 }
  0xc4   : > { %v514_v14 = vpop.eup %513 }
  0xc5   : > { %v135_v15 = vmul.f32 %v514_v14, %v134_v13 }
  0xc7   : > { %v136_v16 = vmul.f32 4.0, %v135_v15 }
  0xc9   : > { %v469_v17 = vtrunc.f32 %v136_v16 }
  0xcb   : > { %v470_v19 = vcvt.f32.s32 %v469_v17 }
  0xcd   : > { %vm138_vm1 = vcmp.gt.s32.totalorder %v470_v19, 0 }
  0xce   : > { %v139_v21 = vsel %vm138_vm1, %v470_v19, 0 }
  0xcf   : > { %vm140_vm2 = vcmp.lt.s32.totalorder %v139_v21, 3 }
  0xd0   : > { %v647_v23 = vsel %vm140_vm2, %v139_v21, 3 }
  0xd1   : > { %v142_v25 = vmul.u32 4, %v647_v23  ;;  %v143_v26 = vrot.slane %v647_v23, 1  ;;  %v148_v47 = vrot.slane %v647_v23, %v147_v44 }
  0xd3   : > { %v144_v27 = vadd.s32 %v143_v26, %v142_v25 }
  0xd5   : > { %v156_v28 = vrot.slane %v144_v27, %v155_v24 }
  0xd7   : > { %218 = vbcast.lane.b32.xlu1 %v156_v28, 376  ;;  %214 = vbcast.lane.b32.xlu0 %v156_v28, 368 }
  0xdb   : > { %206 = vbcast.lane.b32.xlu1 %v156_v28, 352  ;;  %182 = vbcast.lane.b32.xlu0 %v156_v28, 304 }
  0xdf   : > { %210 = vbcast.lane.b32.xlu1 %v156_v28, 360  ;;  %174 = vbcast.lane.b32.xlu0 %v156_v28, 288 }
  0xe3   : > { %198 = vbcast.lane.b32.xlu1 %v156_v28, 336  ;;  %166 = vbcast.lane.b32.xlu0 %v156_v28, 272 }
  0xe7   : > { %202 = vbcast.lane.b32.xlu1 %v156_v28, 344  ;;  %158 = vbcast.lane.b32.xlu0 %v156_v28, 256 }
  0xeb   : > { %190 = vbcast.lane.b32.xlu1 %v156_v28, 320 }
  0xef   : > { %194 = vbcast.lane.b32.xlu1 %v156_v28, 328 }
  0xf3   : > { %186 = vbcast.lane.b32.xlu1 %v156_v28, 312 }
  0xf7   : > { %178 = vbcast.lane.b32.xlu1 %v156_v28, 296 }
  0xfb   : > { %170 = vbcast.lane.b32.xlu1 %v156_v28, 280 }
  0xff   : > { %162 = vbcast.lane.b32.xlu1 %v156_v28, 264 }
 0x149   : > { %v219_v30 = vpop.permute.xlu1 %218  ;;  %v215_v31 = vpop.permute.xlu0 %214 }
 0x14a   : > { %vm235_vm4 = vcmp.eq.s32.totalorder %v219_v30, %v133_v29  ;;  %vm234_vm5 = vcmp.eq.s32.totalorder %v215_v31, %v133_v29 }
 0x14b   : > { %vm417_vm6 = vmpackc.low %vm235_vm4, %vm234_vm5 }
 0x14c   : > { %450 = vmatpush3.bf16.msk.msra.mxu0 %vm417_vm6, %v579_v32 }
 0x14d   : > { %v207_v33 = vpop.permute.xlu1 %206  ;;  %451 = vmatprep.subr.bf16.mxu0 %v577_v20  ;;  %v183_v37 = vpop.permute.xlu0 %182 }
 0x14e   : > { %vm232_vm7 = vcmp.eq.s32.totalorder %v207_v33, %v133_v29  ;;  %vm226_vm0 = vcmp.eq.s32.totalorder %v183_v37, %v133_v29 }
 0x151   : > { %v211_v34 = vpop.permute.xlu1 %210  ;;  %v175_v40 = vpop.permute.xlu0 %174 }
 0x152   : > { %vm233_vm8 = vcmp.eq.s32.totalorder %v211_v34, %v133_v29  ;;  %vm224_vm3 = vcmp.eq.s32.totalorder %v175_v40, %v133_v29 }
 0x153   : > { %vm419_vm9 = vmpackc.low %vm233_vm8, %vm232_vm7 }
 0x154   : > { %452 = vmatpush3.bf16.msk.msra.mxu0 %vm419_vm9, %v579_v32 }
 0x155   : > { %v199_v35 = vpop.permute.xlu1 %198  ;;  %453 = vmatprep.subr.bf16.mxu0 %v577_v20  ;;  %v167_v42 = vpop.permute.xlu0 %166 }
 0x156   : > { %vm230_vm10 = vcmp.eq.s32.totalorder %v199_v35, %v133_v29  ;;  %vm222_vm6 = vcmp.eq.s32.totalorder %v167_v42, %v133_v29 }
 0x159   : > { %v203_v36 = vpop.permute.xlu1 %202  ;;  %v159_v46 = vpop.permute.xlu0 %158 }
 0x15a   : > { %vm231_vm11 = vcmp.eq.s32.totalorder %v203_v36, %v133_v29  ;;  %vm220_vm9 = vcmp.eq.s32.totalorder %v159_v46, %v133_v29 }
 0x15b   : > { %vm421_vm12 = vmpackc.low %vm231_vm11, %vm230_vm10 }
 0x15c   : > { %454 = vmatpush3.bf16.msk.msra.mxu0 %vm421_vm12, %v579_v32  ;;  %vm149_vm12 = vcmp.eq.s32.totalorder %v148_v47, %v645_v22 }
 0x15d   : > { %v191_v38 = vpop.permute.xlu1 %190  ;;  %455 = vmatprep.subr.bf16.mxu0 %v577_v20 }
 0x15e   : > { %vm228_vm13 = vcmp.eq.s32.totalorder %v191_v38, %v133_v29 }
 0x161   : > { %v195_v39 = vpop.permute.xlu1 %194 }
 0x162   : > { %vm229_vm14 = vcmp.eq.s32.totalorder %v195_v39, %v133_v29 }
 0x163   : > { %vm423_vm15 = vmpackc.low %vm229_vm14, %vm228_vm13  ;;  %vm319_vm14 = vcmask 125952  }
 0x164   : > { %456 = vmatpush3.bf16.msk.msra.mxu0 %vm423_vm15, %v579_v32  ;;  %vm433_vm13 = vmpackc.low %vm149_vm12, %vm149_vm12 }
 0x165   : > { %v187_v41 = vpop.permute.xlu1 %186  ;;  %457 = vmatprep.subr.bf16.mxu0 %v577_v20 }
 0x166   : > { %vm227_vm1 = vcmp.eq.s32.totalorder %v187_v41, %v133_v29 }
 0x167   : > { %vm425_vm2 = vmpackc.low %vm227_vm1, %vm226_vm0 }
 0x168   : > { %458 = vmatpush3.bf16.msk.msra.mxu0 %vm425_vm2, %v579_v32 }
 0x169   : > { %v179_v43 = vpop.permute.xlu1 %178  ;;  %459 = vmatprep.subr.bf16.mxu0 %v577_v20 }
 0x16a   : > { %vm225_vm4 = vcmp.eq.s32.totalorder %v179_v43, %v133_v29 }
 0x16b   : > { %vm427_vm5 = vmpackc.low %vm225_vm4, %vm224_vm3 }
 0x16c   : > { %460 = vmatpush3.bf16.msk.msra.mxu0 %vm427_vm5, %v579_v32 }
 0x16d   : > { %v171_v45 = vpop.permute.xlu1 %170  ;;  %461 = vmatprep.subr.bf16.mxu0 %v577_v20 }
 0x16e   : > { %vm223_vm7 = vcmp.eq.s32.totalorder %v171_v45, %v133_v29 }
 0x16f   : > { %vm429_vm8 = vmpackc.low %vm223_vm7, %vm222_vm6 }
 0x170   : > { %462 = vmatpush3.bf16.msk.msra.mxu0 %vm429_vm8, %v579_v32 }
 0x171   : > { %v163_v48 = vpop.permute.xlu1 %162  ;;  %463 = vmatprep.subr.bf16.mxu0 %v577_v20 }
 0x172   : > { %vm221_vm10 = vcmp.eq.s32.totalorder %v163_v48, %v133_v29 }
 0x173   : > { %vm431_vm11 = vmpackc.low %vm221_vm10, %vm220_vm9 }
 0x174   : > { %464 = vmatpush3.bf16.msk.msra.mxu0 %vm431_vm11, %v579_v32 }
 0x177   : > { %466 = vmatmul.mubr.msk.bf16.vlgmr.msra.gmra.mxu0 %vm433_vm13, %v579_v32 }
 0x237   : > { %v310_v49 = vpop.f32.mrf.mxu0 }
 0x238   : > { %vm316_vm15 = vcmp.gt.f32.partialorder %v310_v49, 0.0 }
 0x239   : > { %v435_v50 = vsel %vm316_vm15, 1.0, %v577_v20  ;;  %v467_v51 = vpop.f32.mrf.mxu0 }
 0x23a   : > { %320 = vst.msk [vmem:[%s107_s26] sm:$0xf] %vm319_vm14, %v435_v50 }
 0x23b   : > { %v313_v52 = vpop.f32.mrf.mxu0 }
 0x23c   : > { %528 = shalt.err (!%p525_p3)
}
 0x23d   : > { %s529_s11 = scalar_lea.hbm %s668_s30, 64  ;;  %s533_s18 = scalar_lea.hbm %s711_s1, 128 }
 0x23e   : > { %p530_p4 = scmp.ne.s32.totalorder %s668_s30, %s529_s11  ;;  %p534_p9 = scmp.lt.s32.totalorder %s668_s30, %s711_s1 }
 0x23f   : > { %p535_p10 = scmp.lt.s32.totalorder %s533_s18, %s529_s11 }
 0x240   : > { %p531_p7 = pnand %p530_p4, %p629_p5 }
 0x241   : > { %p536_p11 = por %p535_p10, %p534_p9 }
 0x242   : > { %p532_p8 = pneg %p531_p7 }
 0x244   : > { %p537_p12 = pnand %p536_p11, %p532_p8 }
 0x246   : > { %540 = shalt.err (!%p537_p12)
}
 0x247   : > { %471 = dma.vmem_to_hbm [thread:$0]  (%p629_p5), %s670_s27, 64, %s668_s30, %s322_s2   ;;  %v468_v53 = vpop.f32.mrf.mxu0 }
 0x248 PF: > { %p477_p13 = scmp.ge.s32.totalorder %s575_s9, 2  ;;  %s347_s21 = sand.u32 1, %s563_s6  }
 0x249   : > { %s348_s22 = scalar_lea.sflag [#allocation3], %s347_s21 }
 0x24a   : > { %p474_p0 = pnand %p477_p13, %p633_p6 }
 0x24c   : > { %p475_p1 = pneg %p474_p0 }
 0x24e   : > { %558 = dma.done.wait (%p475_p1), %s348_s22, 64  }
 0x24f   : > { %560 = vsyncadd (%p475_p1), %s348_s22, 4294967232  ;;  %p11_p2 = scmp.ge.s32.totalorder %s616_s12, 4   ;;  %s714_s6 = smov %s567_s7 }
 0x250   : > { %s715_s7 = smov %s571_s8  ;;  %s716_s8 = smov %s627_s15 }
 0x251   : > { %s717_s9 = smov %s616_s12  ;;  %13 = sbr.rel (!%p11_p2) target bundleno = 3 (0x3), region = 59 }
 0x256   :  { %353 = vsyncpa [#allocation3], 1 }
 0x257   :  { %355 = vsyncpa [#allocation3 + $0x1], 1 }

</bundles_post_ra>
